<compile_context>
chip_gen: v5e
topology: v5e:2x2
jax: 0.10.0
libtpu: 0.0.40
codegen_flags: <defaults>
</compile_context>

<pallas_src>
import functools

import jax
import jax.numpy as jnp
from jax.experimental import pallas as pl
from jax.experimental.pallas import tpu as pltpu


# ----------------------------------------------------------------------------
# Kernel 1: implicit-GEMM 3x3 conv + per-batch partial BN statistics
# ----------------------------------------------------------------------------
def _make_conv_stats_kernel(s, oh, ow, c_in, c_out_pad):
    ohw = oh * ow

    def kernel(x_ref, w_ref, y_ref, sum_ref, sumsq_ref):
        # x_ref:     (1, s, s, HPs, WPs, C_in)  phase-split zero-padded input
        # w_ref:     (9, C_in, C_out_pad)       per-tap weights (lane-dense)
        # y_ref:     (1, OH*OW, C_out_pad)      conv output for this batch elem
        # sum_ref:   (1, 1, C_out_pad)          per-batch partial sum
        # sumsq_ref: (1, 1, C_out_pad)          per-batch partial sum of squares
        for t in range(9):                      # static unrolled 9-tap loop
            dh, dw = t // 3, t % 3
            off_h, ph_h = dh // s, dh % s
            off_w, ph_w = dw // s, dw % s
            xt = x_ref[0, ph_h, ph_w, pl.ds(off_h, oh), pl.ds(off_w, ow), :]
            xt = xt.reshape(ohw, c_in)
            tap = jnp.dot(xt, w_ref[t], preferred_element_type=jnp.float32)
            if t == 0:
                # Accumulate in the VMEM-resident f32 output block.
                y_ref[0] = tap
            else:
                y_ref[0] += tap
        acc = y_ref[0]
        sum_ref[0] = jnp.sum(acc, axis=0, keepdims=True)
        sumsq_ref[0] = jnp.sum(acc * acc, axis=0, keepdims=True)

    return kernel


# ----------------------------------------------------------------------------
# Kernel 2: apply BatchNorm affine transform  y * scale + shift  (in place)
# ----------------------------------------------------------------------------
def _bn_apply_kernel(y_ref, scale_ref, shift_ref, o_ref):
    o_ref[...] = y_ref[...] * scale_ref[...] + shift_ref[...]


# ----------------------------------------------------------------------------
# Wrapper
# ----------------------------------------------------------------------------
@functools.partial(jax.jit, static_argnames=("stride", "use_bf16"))
def conv_block_3x3(x_nchw, conv_weight, gamma, beta, *, stride, eps=1e-5,
                   use_bf16=False):
    """Forward of ConvBlock3x3 (Conv2d 3x3 pad=1 bias=False -> BatchNorm2d).

    x_nchw:      (N, C_in, H, W)        float32
    conv_weight: (C_out, C_in, 3, 3)    float32   (PyTorch layout)
    gamma, beta: (C_out,)               float32   (BatchNorm affine params)
    returns:     (N, C_out, OH, OW)     float32
    """
    n, c_in, h, w = x_nchw.shape
    c_out = conv_weight.shape[0]
    s = stride

    oh = (h + 2 - 3) // s + 1
    ow = (w + 2 - 3) // s + 1
    ohw = oh * ow

    # Padded spatial extents: cover conv padding=1 and round up to a multiple
    # of the stride so the phase-split reshape is exact.
    hp = max(s * (oh - 1) + 3, h + 2)
    hp = ((hp + s - 1) // s) * s
    wp = max(s * (ow - 1) + 3, w + 2)
    wp = ((wp + s - 1) // s) * s
    hps, wps = hp // s, wp // s

    c_out_pad = ((c_out + 127) // 128) * 128        # lane-dense output width
    in_dtype = jnp.bfloat16 if use_bf16 else jnp.float32
    itemsize = 2 if use_bf16 else 4

    # NCHW -> NHWC, zero-pad, split stride phases:
    #   xp[n, s*a+p, s*b+q, c]  ->  x_split[n, p, q, a, b, c]
    # so every tap (dh, dw) becomes a unit-stride static window in the kernel.
    x_nhwc = jnp.transpose(x_nchw, (0, 2, 3, 1)).astype(jnp.float32)
    xp = jnp.pad(x_nhwc, ((0, 0), (1, hp - h - 1), (1, wp - w - 1), (0, 0)))
    x_split = xp.reshape(n, hps, s, wps, s, c_in).transpose(0, 2, 4, 1, 3, 5)
    x_split = x_split.astype(in_dtype)              # (N, s, s, HPs, WPs, C_in)

    # (C_out, C_in, 3, 3) -> (9, C_in, C_out) -> pad C_out to c_out_pad lanes.
    w_taps = jnp.transpose(conv_weight, (2, 3, 1, 0)).reshape(9, c_in, c_out)
    w_taps = jnp.pad(w_taps, ((0, 0), (0, 0), (0, c_out_pad - c_out)))
    w_taps = w_taps.astype(in_dtype)

    conv_cost = pl.CostEstimate(
        flops=2 * n * ohw * 9 * c_in * c_out_pad,
        transcendentals=0,
        bytes_accessed=(x_split.size * itemsize + w_taps.size * itemsize
                        + n * ohw * c_out_pad * 4 + 2 * n * c_out_pad * 4),
    )

    # ---- Pallas call 1: implicit-GEMM conv + per-batch partial stats -------
    y, part_sum, part_sumsq = pl.pallas_call(
        _make_conv_stats_kernel(s, oh, ow, c_in, c_out_pad),
        grid=(n,),
        in_specs=[
            pl.BlockSpec((1, s, s, hps, wps, c_in),
                         lambda i: (i, 0, 0, 0, 0, 0)),
            pl.BlockSpec((9, c_in, c_out_pad), lambda i: (0, 0, 0)),
        ],
        out_specs=(
            pl.BlockSpec((1, ohw, c_out_pad), lambda i: (i, 0, 0)),
            pl.BlockSpec((1, 1, c_out_pad), lambda i: (i, 0, 0)),
            pl.BlockSpec((1, 1, c_out_pad), lambda i: (i, 0, 0)),
        ),
        out_shape=(
            jax.ShapeDtypeStruct((n, ohw, c_out_pad), jnp.float32),
            jax.ShapeDtypeStruct((n, 1, c_out_pad), jnp.float32),
            jax.ShapeDtypeStruct((n, 1, c_out_pad), jnp.float32),
        ),
        compiler_params=pltpu.CompilerParams(
            dimension_semantics=("parallel",),
            vmem_limit_bytes=64 * 1024 * 1024),
        cost_estimate=conv_cost,
    )(x_split, w_taps)

    # ---- tiny scalar glue: combine partials -> mean / var -> scale & shift --
    m_total = n * ohw
    tot_sum = jnp.sum(part_sum, axis=0)                 # (1, c_out_pad)
    tot_sq = jnp.sum(part_sumsq, axis=0)                # (1, c_out_pad)
    mean = tot_sum / m_total
    var = jnp.maximum(tot_sq / m_total - mean * mean, 0.0)   # biased (BN train)
    inv_std = jax.lax.rsqrt(var + eps)
    gamma_p = jnp.pad(gamma.astype(jnp.float32), (0, c_out_pad - c_out))
    beta_p = jnp.pad(beta.astype(jnp.float32), (0, c_out_pad - c_out))
    scale2d = gamma_p[None, :] * inv_std                 # (1, c_out_pad)
    shift2d = beta_p[None, :] - mean * scale2d           # (1, c_out_pad)
    scale = scale2d[None]                                # (1, 1, c_out_pad)
    shift = shift2d[None]

    bn_cost = pl.CostEstimate(
        flops=2 * n * ohw * c_out_pad,
        transcendentals=0,
        bytes_accessed=2 * n * ohw * c_out_pad * 4 + 2 * c_out_pad * 4,
    )

    # ---- Pallas call 2: apply BatchNorm (in place over y) -------------------
    y_bn = pl.pallas_call(
        _bn_apply_kernel,
        grid=(n,),
        in_specs=[
            pl.BlockSpec((1, ohw, c_out_pad), lambda i: (i, 0, 0)),
            pl.BlockSpec((1, 1, c_out_pad), lambda i: (0, 0, 0)),
            pl.BlockSpec((1, 1, c_out_pad), lambda i: (0, 0, 0)),
        ],
        out_specs=pl.BlockSpec((1, ohw, c_out_pad), lambda i: (i, 0, 0)),
        out_shape=jax.ShapeDtypeStruct((n, ohw, c_out_pad), jnp.float32),
        input_output_aliases={0: 0},
        compiler_params=pltpu.CompilerParams(
            dimension_semantics=("parallel",),
            vmem_limit_bytes=64 * 1024 * 1024),
        cost_estimate=bn_cost,
    )(y, scale, shift)

    # Slice off channel padding, restore NCHW.
    out = y_bn[:, :, :c_out].reshape(n, oh, ow, c_out).transpose(0, 3, 1, 2)
    return out


# ----------------------------------------------------------------------------
# Pure-JAX reference (for a sanity check)
# ----------------------------------------------------------------------------
def _reference(x_nchw, conv_weight, gamma, beta, stride, eps=1e-5):
    y = jax.lax.conv_general_dilated(
        x_nchw, conv_weight,
        window_strides=(stride, stride),
        padding=((1, 1), (1, 1)),
        dimension_numbers=("NCHW", "OIHW", "NCHW"))
    mean = jnp.mean(y, axis=(0, 2, 3), keepdims=True)
    var = jnp.mean((y - mean) ** 2, axis=(0, 2, 3), keepdims=True)
    y_hat = (y - mean) * jax.lax.rsqrt(var + eps)
    return y_hat * gamma[None, :, None, None] + beta[None, :, None, None]


if __name__ == "__main__":
    key = jax.random.PRNGKey(0)
    k_x, k_w, k_g, k_b = jax.random.split(key, 4)

    N, C_IN, H, W = 2, 4, 16, 16
    C_OUT = 8

    x = jax.random.normal(k_x, (N, C_IN, H, W), dtype=jnp.float32)
    conv_w = jax.random.normal(k_w, (C_OUT, C_IN, 3, 3), dtype=jnp.float32) * 0.1
    gamma = jax.random.normal(k_g, (C_OUT,), dtype=jnp.float32) * 0.1 + 1.0
    beta = jax.random.normal(k_b, (C_OUT,), dtype=jnp.float32) * 0.1

    # stride=2 (as used by XCiT conv patch embedding)
    out2 = conv_block_3x3(x, conv_w, gamma, beta, stride=2)
    out2 = jax.block_until_ready(out2)
    ref2 = _reference(x, conv_w, gamma, beta, 2)
    assert out2.shape == (N, C_OUT, H // 2, W // 2)
    err2 = float(jnp.max(jnp.abs(out2 - ref2)))
    assert err2 < 1e-4, f"stride=2 mismatch vs reference: {err2}"

    # stride=1 path as well
    out1 = conv_block_3x3(x, conv_w, gamma, beta, stride=1)
    out1 = jax.block_until_ready(out1)
    ref1 = _reference(x, conv_w, gamma, beta, 1)
    assert out1.shape == (N, C_OUT, H, W)
    err1 = float(jnp.max(jnp.abs(out1 - ref1)))
    assert err1 < 1e-4, f"stride=1 mismatch vs reference: {err1}"

    print("KERNEL_OK")
</pallas_src>

<mosaic_0001>
module attributes {stable_mosaic.version = 11 : i64} {
  func.func @_bn_apply_kernel(%arg0: i32, %arg1: memref<1x64x128xf32, #tpu.memory_space<vmem>>, %arg2: memref<1x1x128xf32, #tpu.memory_space<vmem>>, %arg3: memref<1x1x128xf32, #tpu.memory_space<vmem>>, %arg4: memref<1x64x128xf32, #tpu.memory_space<vmem>>) attributes {dimension_semantics = [#tpu.dimension_semantics<parallel>], iteration_bounds = array<i64: 2>, scalar_prefetch = 0 : i64, scratch_operands = 0 : i64, tpu.core_type = #tpu.core_type<tc>, window_params = [{transform_indices = @transform_0, window_bounds = array<i64: 1, 64, 128>}, {pipeline_mode = #tpu.pipeline_mode<synchronous>, transform_indices = @transform_1, window_bounds = array<i64: 1, 1, 128>}, {pipeline_mode = #tpu.pipeline_mode<synchronous>, transform_indices = @transform_2, window_bounds = array<i64: 1, 1, 128>}, {transform_indices = @transform_3, window_bounds = array<i64: 1, 64, 128>}]} {
    %c0 = arith.constant 0 : index
    %c0_0 = arith.constant 0 : index
    %c0_1 = arith.constant 0 : index
    %0 = vector.load %arg1[%c0, %c0_0, %c0_1] : memref<1x64x128xf32, #tpu.memory_space<vmem>>, vector<1x64x128xf32>
    %c0_2 = arith.constant 0 : index
    %c0_3 = arith.constant 0 : index
    %c0_4 = arith.constant 0 : index
    %1 = vector.load %arg2[%c0_2, %c0_3, %c0_4] : memref<1x1x128xf32, #tpu.memory_space<vmem>>, vector<1x1x128xf32>
    %2 = vector.broadcast %1 : vector<1x1x128xf32> to vector<1x64x128xf32>
    %3 = arith.mulf %0, %2 : vector<1x64x128xf32>
    %c0_5 = arith.constant 0 : index
    %c0_6 = arith.constant 0 : index
    %c0_7 = arith.constant 0 : index
    %4 = vector.load %arg3[%c0_5, %c0_6, %c0_7] : memref<1x1x128xf32, #tpu.memory_space<vmem>>, vector<1x1x128xf32>
    %5 = vector.broadcast %4 : vector<1x1x128xf32> to vector<1x64x128xf32>
    %6 = arith.addf %3, %5 : vector<1x64x128xf32>
    %c0_8 = arith.constant 0 : index
    %c0_9 = arith.constant 0 : index
    %c0_10 = arith.constant 0 : index
    %7 = vector.load %arg4[%c0_8, %c0_9, %c0_10] : memref<1x64x128xf32, #tpu.memory_space<vmem>>, vector<1x64x128xf32>
    tpu.vector_store %arg4[%c0_8, %c0_9, %c0_10], %6 {strides = array<i32>} : memref<1x64x128xf32, #tpu.memory_space<vmem>>, vector<1x64x128xf32>,
    return
  }
  func.func @transform_0(%arg0: i32) -> (i32, i32, i32) {
    %c0_i32 = arith.constant 0 : i32
    %c0_i32_0 = arith.constant 0 : i32
    %c0_i32_1 = arith.constant 0 : i32
    return %arg0, %c0_i32, %c0_i32_0 : i32, i32, i32
  }
  func.func @transform_1(%arg0: i32) -> (i32, i32, i32) {
    %c0_i32 = arith.constant 0 : i32
    %c0_i32_0 = arith.constant 0 : i32
    %c0_i32_1 = arith.constant 0 : i32
    %c0_i32_2 = arith.constant 0 : i32
    return %c0_i32, %c0_i32_0, %c0_i32_1 : i32, i32, i32
  }
  func.func @transform_2(%arg0: i32) -> (i32, i32, i32) {
    %c0_i32 = arith.constant 0 : i32
    %c0_i32_0 = arith.constant 0 : i32
    %c0_i32_1 = arith.constant 0 : i32
    %c0_i32_2 = arith.constant 0 : i32
    return %c0_i32, %c0_i32_0, %c0_i32_1 : i32, i32, i32
  }
  func.func @transform_3(%arg0: i32) -> (i32, i32, i32) {
    %c0_i32 = arith.constant 0 : i32
    %c0_i32_0 = arith.constant 0 : i32
    %c0_i32_1 = arith.constant 0 : i32
    return %arg0, %c0_i32, %c0_i32_0 : i32, i32, i32
  }
}

module attributes {stable_mosaic.version = 11 : i64} {
  func.func @kernel(%arg0: i32, %arg1: memref<1x2x2x9x9x4xf32, #tpu.memory_space<vmem>>, %arg2: memref<9x4x128xf32, #tpu.memory_space<vmem>>, %arg3: memref<1x64x128xf32, #tpu.memory_space<vmem>>, %arg4: memref<1x1x128xf32, #tpu.memory_space<vmem>>, %arg5: memref<1x1x128xf32, #tpu.memory_space<vmem>>) attributes {dimension_semantics = [#tpu.dimension_semantics<parallel>], iteration_bounds = array<i64: 2>, scalar_prefetch = 0 : i64, scratch_operands = 0 : i64, tpu.core_type = #tpu.core_type<tc>, window_params = [{transform_indices = @transform_0, window_bounds = array<i64: 1, 2, 2, 9, 9, 4>}, {pipeline_mode = #tpu.pipeline_mode<synchronous>, transform_indices = @transform_1, window_bounds = array<i64: 9, 4, 128>}, {transform_indices = @transform_2, window_bounds = array<i64: 1, 64, 128>}, {transform_indices = @transform_3, window_bounds = array<i64: 1, 1, 128>}, {transform_indices = @transform_4, window_bounds = array<i64: 1, 1, 128>}]} {
    %c0 = arith.constant 0 : index
    %c0_0 = arith.constant 0 : index
    %c0_1 = arith.constant 0 : index
    %c0_2 = arith.constant 0 : index
    %c0_3 = arith.constant 0 : index
    %c0_4 = arith.constant 0 : index
    %0 = vector.load %arg1[%c0, %c0_0, %c0_1, %c0_2, %c0_3, %c0_4] : memref<1x2x2x9x9x4xf32, #tpu.memory_space<vmem>>, vector<1x1x1x8x8x4xf32>
    %1 = vector.shape_cast %0 : vector<1x1x1x8x8x4xf32> to vector<8x8x4xf32>
    %2 = vector.shape_cast %1 : vector<8x8x4xf32> to vector<64x4xf32>
    %c0_5 = arith.constant 0 : index
    %c0_6 = arith.constant 0 : index
    %c0_7 = arith.constant 0 : index
    %3 = vector.load %arg2[%c0_5, %c0_6, %c0_7] : memref<9x4x128xf32, #tpu.memory_space<vmem>>, vector<1x4x128xf32>
    %4 = vector.shape_cast %3 : vector<1x4x128xf32> to vector<4x128xf32>
    %cst = arith.constant dense<0.000000e+00> : vector<64x128xf32>
    %5 = tpu.matmul %2, %4, %cst {dimension_numbers = #tpu.dot_dimension_numbers<[1], [0], [0], [1], [0, 0, 1, 1], [], []>} : vector<64x4xf32>, vector<4x128xf32>, vector<64x128xf32> -> vector<64x128xf32>
    %c0_8 = arith.constant 0 : index
    %c0_9 = arith.constant 0 : index
    %c0_10 = arith.constant 0 : index
    %6 = vector.load %arg3[%c0_8, %c0_9, %c0_10] : memref<1x64x128xf32, #tpu.memory_space<vmem>>, vector<1x64x128xf32>
    %7 = vector.shape_cast %6 : vector<1x64x128xf32> to vector<64x128xf32>
    %8 = vector.shape_cast %5 : vector<64x128xf32> to vector<1x64x128xf32>
    tpu.vector_store %arg3[%c0_8, %c0_9, %c0_10], %8 {strides = array<i32>} : memref<1x64x128xf32, #tpu.memory_space<vmem>>, vector<1x64x128xf32>,
    %c0_11 = arith.constant 0 : index
    %c0_12 = arith.constant 0 : index
    %c1 = arith.constant 1 : index
    %c0_13 = arith.constant 0 : index
    %c0_14 = arith.constant 0 : index
    %c0_15 = arith.constant 0 : index
    %9 = vector.load %arg1[%c0_11, %c0_12, %c1, %c0_13, %c0_14, %c0_15] : memref<1x2x2x9x9x4xf32, #tpu.memory_space<vmem>>, vector<1x1x1x8x8x4xf32>
    %10 = vector.shape_cast %9 : vector<1x1x1x8x8x4xf32> to vector<8x8x4xf32>
    %11 = vector.shape_cast %10 : vector<8x8x4xf32> to vector<64x4xf32>
    %c1_16 = arith.constant 1 : index
    %c0_17 = arith.constant 0 : index
    %c0_18 = arith.constant 0 : index
    %12 = vector.load %arg2[%c1_16, %c0_17, %c0_18] : memref<9x4x128xf32, #tpu.memory_space<vmem>>, vector<1x4x128xf32>
    %13 = vector.shape_cast %12 : vector<1x4x128xf32> to vector<4x128xf32>
    %cst_19 = arith.constant dense<0.000000e+00> : vector<64x128xf32>
    %14 = tpu.matmul %11, %13, %cst_19 {dimension_numbers = #tpu.dot_dimension_numbers<[1], [0], [0], [1], [0, 0, 1, 1], [], []>} : vector<64x4xf32>, vector<4x128xf32>, vector<64x128xf32> -> vector<64x128xf32>
    %c0_20 = arith.constant 0 : index
    %c0_21 = arith.constant 0 : index
    %c0_22 = arith.constant 0 : index
    %15 = vector.load %arg3[%c0_20, %c0_21, %c0_22] : memref<1x64x128xf32, #tpu.memory_space<vmem>>, vector<1x64x128xf32>
    %16 = vector.shape_cast %15 : vector<1x64x128xf32> to vector<64x128xf32>
    %17 = arith.addf %16, %14 : vector<64x128xf32>
    %c0_23 = arith.constant 0 : index
    %c0_24 = arith.constant 0 : index
    %c0_25 = arith.constant 0 : index
    %18 = vector.load %arg3[%c0_23, %c0_24, %c0_25] : memref<1x64x128xf32, #tpu.memory_space<vmem>>, vector<1x64x128xf32>
    %19 = vector.shape_cast %18 : vector<1x64x128xf32> to vector<64x128xf32>
    %20 = vector.shape_cast %17 : vector<64x128xf32> to vector<1x64x128xf32>
    tpu.vector_store %arg3[%c0_23, %c0_24, %c0_25], %20 {strides = array<i32>} : memref<1x64x128xf32, #tpu.memory_space<vmem>>, vector<1x64x128xf32>,
    %c0_26 = arith.constant 0 : index
    %c0_27 = arith.constant 0 : index
    %c0_28 = arith.constant 0 : index
    %c0_29 = arith.constant 0 : index
    %c1_30 = arith.constant 1 : index
    %c0_31 = arith.constant 0 : index
    %21 = vector.load %arg1[%c0_26, %c0_27, %c0_28, %c0_29, %c1_30, %c0_31] : memref<1x2x2x9x9x4xf32, #tpu.memory_space<vmem>>, vector<1x1x1x8x8x4xf32>
    %22 = vector.shape_cast %21 : vector<1x1x1x8x8x4xf32> to vector<8x8x4xf32>
    %23 = vector.shape_cast %22 : vector<8x8x4xf32> to vector<64x4xf32>
    %c2 = arith.constant 2 : index
    %c0_32 = arith.constant 0 : index
    %c0_33 = arith.constant 0 : index
    %24 = vector.load %arg2[%c2, %c0_32, %c0_33] : memref<9x4x128xf32, #tpu.memory_space<vmem>>, vector<1x4x128xf32>
    %25 = vector.shape_cast %24 : vector<1x4x128xf32> to vector<4x128xf32>
    %cst_34 = arith.constant dense<0.000000e+00> : vector<64x128xf32>
    %26 = tpu.matmul %23, %25, %cst_34 {dimension_numbers = #tpu.dot_dimension_numbers<[1], [0], [0], [1], [0, 0, 1, 1], [], []>} : vector<64x4xf32>, vector<4x128xf32>, vector<64x128xf32> -> vector<64x128xf32>
    %c0_35 = arith.constant 0 : index
    %c0_36 = arith.constant 0 : index
    %c0_37 = arith.constant 0 : index
    %27 = vector.load %arg3[%c0_35, %c0_36, %c0_37] : memref<1x64x128xf32, #tpu.memory_space<vmem>>, vector<1x64x128xf32>
    %28 = vector.shape_cast %27 : vector<1x64x128xf32> to vector<64x128xf32>
    %29 = arith.addf %28, %26 : vector<64x128xf32>
    %c0_38 = arith.constant 0 : index
    %c0_39 = arith.constant 0 : index
    %c0_40 = arith.constant 0 : index
    %30 = vector.load %arg3[%c0_38, %c0_39, %c0_40] : memref<1x64x128xf32, #tpu.memory_space<vmem>>, vector<1x64x128xf32>
    %31 = vector.shape_cast %30 : vector<1x64x128xf32> to vector<64x128xf32>
    %32 = vector.shape_cast %29 : vector<64x128xf32> to vector<1x64x128xf32>
    tpu.vector_store %arg3[%c0_38, %c0_39, %c0_40], %32 {strides = array<i32>} : memref<1x64x128xf32, #tpu.memory_space<vmem>>, vector<1x64x128xf32>,
    %c0_41 = arith.constant 0 : index
    %c1_42 = arith.constant 1 : index
    %c0_43 = arith.constant 0 : index
    %c0_44 = arith.constant 0 : index
    %c0_45 = arith.constant 0 : index
    %c0_46 = arith.constant 0 : index
    %33 = vector.load %arg1[%c0_41, %c1_42, %c0_43, %c0_44, %c0_45, %c0_46] : memref<1x2x2x9x9x4xf32, #tpu.memory_space<vmem>>, vector<1x1x1x8x8x4xf32>
    %34 = vector.shape_cast %33 : vector<1x1x1x8x8x4xf32> to vector<8x8x4xf32>
    %35 = vector.shape_cast %34 : vector<8x8x4xf32> to vector<64x4xf32>
    %c3 = arith.constant 3 : index
    %c0_47 = arith.constant 0 : index
    %c0_48 = arith.constant 0 : index
    %36 = vector.load %arg2[%c3, %c0_47, %c0_48] : memref<9x4x128xf32, #tpu.memory_space<vmem>>, vector<1x4x128xf32>
    %37 = vector.shape_cast %36 : vector<1x4x128xf32> to vector<4x128xf32>
    %cst_49 = arith.constant dense<0.000000e+00> : vector<64x128xf32>
    %38 = tpu.matmul %35, %37, %cst_49 {dimension_numbers = #tpu.dot_dimension_numbers<[1], [0], [0], [1], [0, 0, 1, 1], [], []>} : vector<64x4xf32>, vector<4x128xf32>, vector<64x128xf32> -> vector<64x128xf32>
    %c0_50 = arith.constant 0 : index
    %c0_51 = arith.constant 0 : index
    %c0_52 = arith.constant 0 : index
    %39 = vector.load %arg3[%c0_50, %c0_51, %c0_52] : memref<1x64x128xf32, #tpu.memory_space<vmem>>, vector<1x64x128xf32>
    %40 = vector.shape_cast %39 : vector<1x64x128xf32> to vector<64x128xf32>
    %41 = arith.addf %40, %38 : vector<64x128xf32>
    %c0_53 = arith.constant 0 : index
    %c0_54 = arith.constant 0 : index
    %c0_55 = arith.constant 0 : index
    %42 = vector.load %arg3[%c0_53, %c0_54, %c0_55] : memref<1x64x128xf32, #tpu.memory_space<vmem>>, vector<1x64x128xf32>
    %43 = vector.shape_cast %42 : vector<1x64x128xf32> to vector<64x128xf32>
    %44 = vector.shape_cast %41 : vector<64x128xf32> to vector<1x64x128xf32>
    tpu.vector_store %arg3[%c0_53, %c0_54, %c0_55], %44 {strides = array<i32>} : memref<1x64x128xf32, #tpu.memory_space<vmem>>, vector<1x64x128xf32>,
    %c0_56 = arith.constant 0 : index
    %c1_57 = arith.constant 1 : index
    %c1_58 = arith.constant 1 : index
    %c0_59 = arith.constant 0 : index
    %c0_60 = arith.constant 0 : index
    %c0_61 = arith.constant 0 : index
    %45 = vector.load %arg1[%c0_56, %c1_57, %c1_58, %c0_59, %c0_60, %c0_61] : memref<1x2x2x9x9x4xf32, #tpu.memory_space<vmem>>, vector<1x1x1x8x8x4xf32>
    %46 = vector.shape_cast %45 : vector<1x1x1x8x8x4xf32> to vector<8x8x4xf32>
    %47 = vector.shape_cast %46 : vector<8x8x4xf32> to vector<64x4xf32>
    %c4 = arith.constant 4 : index
    %c0_62 = arith.constant 0 : index
    %c0_63 = arith.constant 0 : index
    %48 = vector.load %arg2[%c4, %c0_62, %c0_63] : memref<9x4x128xf32, #tpu.memory_space<vmem>>, vector<1x4x128xf32>
    %49 = vector.shape_cast %48 : vector<1x4x128xf32> to vector<4x128xf32>
    %cst_64 = arith.constant dense<0.000000e+00> : vector<64x128xf32>
    %50 = tpu.matmul %47, %49, %cst_64 {dimension_numbers = #tpu.dot_dimension_numbers<[1], [0], [0], [1], [0, 0, 1, 1], [], []>} : vector<64x4xf32>, vector<4x128xf32>, vector<64x128xf32> -> vector<64x128xf32>
    %c0_65 = arith.constant 0 : index
    %c0_66 = arith.constant 0 : index
    %c0_67 = arith.constant 0 : index
    %51 = vector.load %arg3[%c0_65, %c0_66, %c0_67] : memref<1x64x128xf32, #tpu.memory_space<vmem>>, vector<1x64x128xf32>
    %52 = vector.shape_cast %51 : vector<1x64x128xf32> to vector<64x128xf32>
    %53 = arith.addf %52, %50 : vector<64x128xf32>
    %c0_68 = arith.constant 0 : index
    %c0_69 = arith.constant 0 : index
    %c0_70 = arith.constant 0 : index
    %54 = vector.load %arg3[%c0_68, %c0_69, %c0_70] : memref<1x64x128xf32, #tpu.memory_space<vmem>>, vector<1x64x128xf32>
    %55 = vector.shape_cast %54 : vector<1x64x128xf32> to vector<64x128xf32>
    %56 = vector.shape_cast %53 : vector<64x128xf32> to vector<1x64x128xf32>
    tpu.vector_store %arg3[%c0_68, %c0_69, %c0_70], %56 {strides = array<i32>} : memref<1x64x128xf32, #tpu.memory_space<vmem>>, vector<1x64x128xf32>,
    %c0_71 = arith.constant 0 : index
    %c1_72 = arith.constant 1 : index
    %c0_73 = arith.constant 0 : index
    %c0_74 = arith.constant 0 : index
    %c1_75 = arith.constant 1 : index
    %c0_76 = arith.constant 0 : index
    %57 = vector.load %arg1[%c0_71, %c1_72, %c0_73, %c0_74, %c1_75, %c0_76] : memref<1x2x2x9x9x4xf32, #tpu.memory_space<vmem>>, vector<1x1x1x8x8x4xf32>
    %58 = vector.shape_cast %57 : vector<1x1x1x8x8x4xf32> to vector<8x8x4xf32>
    %59 = vector.shape_cast %58 : vector<8x8x4xf32> to vector<64x4xf32>
    %c5 = arith.constant 5 : index
    %c0_77 = arith.constant 0 : index
    %c0_78 = arith.constant 0 : index
    %60 = vector.load %arg2[%c5, %c0_77, %c0_78] : memref<9x4x128xf32, #tpu.memory_space<vmem>>, vector<1x4x128xf32>
    %61 = vector.shape_cast %60 : vector<1x4x128xf32> to vector<4x128xf32>
    %cst_79 = arith.constant dense<0.000000e+00> : vector<64x128xf32>
    %62 = tpu.matmul %59, %61, %cst_79 {dimension_numbers = #tpu.dot_dimension_numbers<[1], [0], [0], [1], [0, 0, 1, 1], [], []>} : vector<64x4xf32>, vector<4x128xf32>, vector<64x128xf32> -> vector<64x128xf32>
    %c0_80 = arith.constant 0 : index
    %c0_81 = arith.constant 0 : index
    %c0_82 = arith.constant 0 : index
    %63 = vector.load %arg3[%c0_80, %c0_81, %c0_82] : memref<1x64x128xf32, #tpu.memory_space<vmem>>, vector<1x64x128xf32>
    %64 = vector.shape_cast %63 : vector<1x64x128xf32> to vector<64x128xf32>
    %65 = arith.addf %64, %62 : vector<64x128xf32>
    %c0_83 = arith.constant 0 : index
    %c0_84 = arith.constant 0 : index
    %c0_85 = arith.constant 0 : index
    %66 = vector.load %arg3[%c0_83, %c0_84, %c0_85] : memref<1x64x128xf32, #tpu.memory_space<vmem>>, vector<1x64x128xf32>
    %67 = vector.shape_cast %66 : vector<1x64x128xf32> to vector<64x128xf32>
    %68 = vector.shape_cast %65 : vector<64x128xf32> to vector<1x64x128xf32>
    tpu.vector_store %arg3[%c0_83, %c0_84, %c0_85], %68 {strides = array<i32>} : memref<1x64x128xf32, #tpu.memory_space<vmem>>, vector<1x64x128xf32>,
    %c0_86 = arith.constant 0 : index
    %c0_87 = arith.constant 0 : index
    %c0_88 = arith.constant 0 : index
    %c1_89 = arith.constant 1 : index
    %c0_90 = arith.constant 0 : index
    %c0_91 = arith.constant 0 : index
    %69 = vector.load %arg1[%c0_86, %c0_87, %c0_88, %c1_89, %c0_90, %c0_91] : memref<1x2x2x9x9x4xf32, #tpu.memory_space<vmem>>, vector<1x1x1x8x8x4xf32>
    %70 = vector.shape_cast %69 : vector<1x1x1x8x8x4xf32> to vector<8x8x4xf32>
    %71 = vector.shape_cast %70 : vector<8x8x4xf32> to vector<64x4xf32>
    %c6 = arith.constant 6 : index
    %c0_92 = arith.constant 0 : index
    %c0_93 = arith.constant 0 : index
    %72 = vector.load %arg2[%c6, %c0_92, %c0_93] : memref<9x4x128xf32, #tpu.memory_space<vmem>>, vector<1x4x128xf32>
    %73 = vector.shape_cast %72 : vector<1x4x128xf32> to vector<4x128xf32>
    %cst_94 = arith.constant dense<0.000000e+00> : vector<64x128xf32>
    %74 = tpu.matmul %71, %73, %cst_94 {dimension_numbers = #tpu.dot_dimension_numbers<[1], [0], [0], [1], [0, 0, 1, 1], [], []>} : vector<64x4xf32>, vector<4x128xf32>, vector<64x128xf32> -> vector<64x128xf32>
    %c0_95 = arith.constant 0 : index
    %c0_96 = arith.constant 0 : index
    %c0_97 = arith.constant 0 : index
    %75 = vector.load %arg3[%c0_95, %c0_96, %c0_97] : memref<1x64x128xf32, #tpu.memory_space<vmem>>, vector<1x64x128xf32>
    %76 = vector.shape_cast %75 : vector<1x64x128xf32> to vector<64x128xf32>
    %77 = arith.addf %76, %74 : vector<64x128xf32>
    %c0_98 = arith.constant 0 : index
    %c0_99 = arith.constant 0 : index
    %c0_100 = arith.constant 0 : index
    %78 = vector.load %arg3[%c0_98, %c0_99, %c0_100] : memref<1x64x128xf32, #tpu.memory_space<vmem>>, vector<1x64x128xf32>
    %79 = vector.shape_cast %78 : vector<1x64x128xf32> to vector<64x128xf32>
    %80 = vector.shape_cast %77 : vector<64x128xf32> to vector<1x64x128xf32>
    tpu.vector_store %arg3[%c0_98, %c0_99, %c0_100], %80 {strides = array<i32>} : memref<1x64x128xf32, #tpu.memory_space<vmem>>, vector<1x64x128xf32>,
    %c0_101 = arith.constant 0 : index
    %c0_102 = arith.constant 0 : index
    %c1_103 = arith.constant 1 : index
    %c1_104 = arith.constant 1 : index
    %c0_105 = arith.constant 0 : index
    %c0_106 = arith.constant 0 : index
    %81 = vector.load %arg1[%c0_101, %c0_102, %c1_103, %c1_104, %c0_105, %c0_106] : memref<1x2x2x9x9x4xf32, #tpu.memory_space<vmem>>, vector<1x1x1x8x8x4xf32>
    %82 = vector.shape_cast %81 : vector<1x1x1x8x8x4xf32> to vector<8x8x4xf32>
    %83 = vector.shape_cast %82 : vector<8x8x4xf32> to vector<64x4xf32>
    %c7 = arith.constant 7 : index
    %c0_107 = arith.constant 0 : index
    %c0_108 = arith.constant 0 : index
    %84 = vector.load %arg2[%c7, %c0_107, %c0_108] : memref<9x4x128xf32, #tpu.memory_space<vmem>>, vector<1x4x128xf32>
    %85 = vector.shape_cast %84 : vector<1x4x128xf32> to vector<4x128xf32>
    %cst_109 = arith.constant dense<0.000000e+00> : vector<64x128xf32>
    %86 = tpu.matmul %83, %85, %cst_109 {dimension_numbers = #tpu.dot_dimension_numbers<[1], [0], [0], [1], [0, 0, 1, 1], [], []>} : vector<64x4xf32>, vector<4x128xf32>, vector<64x128xf32> -> vector<64x128xf32>
    %c0_110 = arith.constant 0 : index
    %c0_111 = arith.constant 0 : index
    %c0_112 = arith.constant 0 : index
    %87 = vector.load %arg3[%c0_110, %c0_111, %c0_112] : memref<1x64x128xf32, #tpu.memory_space<vmem>>, vector<1x64x128xf32>
    %88 = vector.shape_cast %87 : vector<1x64x128xf32> to vector<64x128xf32>
    %89 = arith.addf %88, %86 : vector<64x128xf32>
    %c0_113 = arith.constant 0 : index
    %c0_114 = arith.constant 0 : index
    %c0_115 = arith.constant 0 : index
    %90 = vector.load %arg3[%c0_113, %c0_114, %c0_115] : memref<1x64x128xf32, #tpu.memory_space<vmem>>, vector<1x64x128xf32>
    %91 = vector.shape_cast %90 : vector<1x64x128xf32> to vector<64x128xf32>
    %92 = vector.shape_cast %89 : vector<64x128xf32> to vector<1x64x128xf32>
    tpu.vector_store %arg3[%c0_113, %c0_114, %c0_115], %92 {strides = array<i32>} : memref<1x64x128xf32, #tpu.memory_space<vmem>>, vector<1x64x128xf32>,
    %c0_116 = arith.constant 0 : index
    %c0_117 = arith.constant 0 : index
    %c0_118 = arith.constant 0 : index
    %c1_119 = arith.constant 1 : index
    %c1_120 = arith.constant 1 : index
    %c0_121 = arith.constant 0 : index
    %93 = vector.load %arg1[%c0_116, %c0_117, %c0_118, %c1_119, %c1_120, %c0_121] : memref<1x2x2x9x9x4xf32, #tpu.memory_space<vmem>>, vector<1x1x1x8x8x4xf32>
    %94 = vector.shape_cast %93 : vector<1x1x1x8x8x4xf32> to vector<8x8x4xf32>
    %95 = vector.shape_cast %94 : vector<8x8x4xf32> to vector<64x4xf32>
    %c8 = arith.constant 8 : index
    %c0_122 = arith.constant 0 : index
    %c0_123 = arith.constant 0 : index
    %96 = vector.load %arg2[%c8, %c0_122, %c0_123] : memref<9x4x128xf32, #tpu.memory_space<vmem>>, vector<1x4x128xf32>
    %97 = vector.shape_cast %96 : vector<1x4x128xf32> to vector<4x128xf32>
    %cst_124 = arith.constant dense<0.000000e+00> : vector<64x128xf32>
    %98 = tpu.matmul %95, %97, %cst_124 {dimension_numbers = #tpu.dot_dimension_numbers<[1], [0], [0], [1], [0, 0, 1, 1], [], []>} : vector<64x4xf32>, vector<4x128xf32>, vector<64x128xf32> -> vector<64x128xf32>
    %c0_125 = arith.constant 0 : index
    %c0_126 = arith.constant 0 : index
    %c0_127 = arith.constant 0 : index
    %99 = vector.load %arg3[%c0_125, %c0_126, %c0_127] : memref<1x64x128xf32, #tpu.memory_space<vmem>>, vector<1x64x128xf32>
    %100 = vector.shape_cast %99 : vector<1x64x128xf32> to vector<64x128xf32>
    %101 = arith.addf %100, %98 : vector<64x128xf32>
    %c0_128 = arith.constant 0 : index
    %c0_129 = arith.constant 0 : index
    %c0_130 = arith.constant 0 : index
    %102 = vector.load %arg3[%c0_128, %c0_129, %c0_130] : memref<1x64x128xf32, #tpu.memory_space<vmem>>, vector<1x64x128xf32>
    %103 = vector.shape_cast %102 : vector<1x64x128xf32> to vector<64x128xf32>
    %104 = vector.shape_cast %101 : vector<64x128xf32> to vector<1x64x128xf32>
    tpu.vector_store %arg3[%c0_128, %c0_129, %c0_130], %104 {strides = array<i32>} : memref<1x64x128xf32, #tpu.memory_space<vmem>>, vector<1x64x128xf32>,
    %c0_131 = arith.constant 0 : index
    %c0_132 = arith.constant 0 : index
    %c0_133 = arith.constant 0 : index
    %105 = vector.load %arg3[%c0_131, %c0_132, %c0_133] : memref<1x64x128xf32, #tpu.memory_space<vmem>>, vector<1x64x128xf32>
    %106 = vector.shape_cast %105 : vector<1x64x128xf32> to vector<64x128xf32>
    %cst_134 = arith.constant dense<0.000000e+00> : vector<128xf32>
    %107 = vector.multi_reduction <add>, %106, %cst_134 [0] : vector<64x128xf32> to vector<128xf32>
    %108 = vector.shape_cast %107 : vector<128xf32> to vector<1x128xf32>
    %c0_135 = arith.constant 0 : index
    %c0_136 = arith.constant 0 : index
    %c0_137 = arith.constant 0 : index
    %109 = vector.load %arg4[%c0_135, %c0_136, %c0_137] : memref<1x1x128xf32, #tpu.memory_space<vmem>>, vector<1x1x128xf32>
    %110 = vector.shape_cast %109 : vector<1x1x128xf32> to vector<1x128xf32>
    %111 = vector.shape_cast %108 : vector<1x128xf32> to vector<1x1x128xf32>
    tpu.vector_store %arg4[%c0_135, %c0_136, %c0_137], %111 {strides = array<i32>} : memref<1x1x128xf32, #tpu.memory_space<vmem>>, vector<1x1x128xf32>,
    %112 = arith.mulf %106, %106 : vector<64x128xf32>
    %cst_138 = arith.constant dense<0.000000e+00> : vector<128xf32>
    %113 = vector.multi_reduction <add>, %112, %cst_138 [0] : vector<64x128xf32> to vector<128xf32>
    %114 = vector.shape_cast %113 : vector<128xf32> to vector<1x128xf32>
    %c0_139 = arith.constant 0 : index
    %c0_140 = arith.constant 0 : index
    %c0_141 = arith.constant 0 : index
    %115 = vector.load %arg5[%c0_139, %c0_140, %c0_141] : memref<1x1x128xf32, #tpu.memory_space<vmem>>, vector<1x1x128xf32>
    %116 = vector.shape_cast %115 : vector<1x1x128xf32> to vector<1x128xf32>
    %117 = vector.shape_cast %114 : vector<1x128xf32> to vector<1x1x128xf32>
    tpu.vector_store %arg5[%c0_139, %c0_140, %c0_141], %117 {strides = array<i32>} : memref<1x1x128xf32, #tpu.memory_space<vmem>>, vector<1x1x128xf32>,
    return
  }
  func.func @transform_0(%arg0: i32) -> (i32, i32, i32, i32, i32, i32) {
    %c0_i32 = arith.constant 0 : i32
    %c0_i32_0 = arith.constant 0 : i32
    %c0_i32_1 = arith.constant 0 : i32
    %c0_i32_2 = arith.constant 0 : i32
    %c0_i32_3 = arith.constant 0 : i32
    %c0_i32_4 = arith.constant 0 : i32
    return %arg0, %c0_i32, %c0_i32_0, %c0_i32_1, %c0_i32_2, %c0_i32_3 : i32, i32, i32, i32, i32, i32
  }
  func.func @transform_1(%arg0: i32) -> (i32, i32, i32) {
    %c0_i32 = arith.constant 0 : i32
    %c0_i32_0 = arith.constant 0 : i32
    %c0_i32_1 = arith.constant 0 : i32
    %c0_i32_2 = arith.constant 0 : i32
    return %c0_i32, %c0_i32_0, %c0_i32_1 : i32, i32, i32
  }
  func.func @transform_2(%arg0: i32) -> (i32, i32, i32) {
    %c0_i32 = arith.constant 0 : i32
    %c0_i32_0 = arith.constant 0 : i32
    %c0_i32_1 = arith.constant 0 : i32
    return %arg0, %c0_i32, %c0_i32_0 : i32, i32, i32
  }
  func.func @transform_3(%arg0: i32) -> (i32, i32, i32) {
    %c0_i32 = arith.constant 0 : i32
    %c0_i32_0 = arith.constant 0 : i32
    %c0_i32_1 = arith.constant 0 : i32
    return %arg0, %c0_i32, %c0_i32_0 : i32, i32, i32
  }
  func.func @transform_4(%arg0: i32) -> (i32, i32, i32) {
    %c0_i32 = arith.constant 0 : i32
    %c0_i32_0 = arith.constant 0 : i32
    %c0_i32_1 = arith.constant 0 : i32
    return %arg0, %c0_i32, %c0_i32_0 : i32, i32, i32
  }
}

</mosaic_0001>

<bundles_post_ra>
// kernel: conv_block_3x3.3
= control target key start
LH: loop header
LB: loop body
LE: loop exit
PB: predicated region body
PF: predicated region fallthrough
CT: control target
= control target key end

     0   :  { %s317_s12 = smov 0   ;;  %s340_s0 = inlined_call_operand.vmem [shape: f32[2,64,128], index: 0, kind: input, shape index: {}, may-alias: {0,3}]   ;;  %s341_s1 = inlined_call_operand.vmem [shape: f32[1,1,128], index: 1, kind: input, shape index: {}]   ;;  %s342_s2 = inlined_call_operand.vmem [shape: f32[1,1,128], index: 2, kind: input, shape index: {}]   ;;  %s343_s3 = inlined_call_operand.vmem [shape: f32[2,64,128], index: 3, kind: output, shape index: {}, may-alias: {0,3}]  }
   0x1 LB: > { %s266_s13 = sadd.s32 4294967295, %s295_s12   ;;  %p270_p0 = scmp.ge.s32.totalorder %s295_s12, 1  ;;  %s295_s12 = sphi %s317_s12, %s13_s12  }
   0x2   : > { %p137_p1 = scmp.lt.s32.totalorder %s295_s12, 3 }
   0x4   : > { %p138_p2 = pnand %p270_p0, %p137_p1 }
   0x5   : > { %p161_p3 = scmp.lt.s32.totalorder (!%p138_p2), %s266_s13, 1 }
   0x6   : > { %141 = sbr.rel (%p138_p2) target bundleno = 27 (0x1b), region = 32 }
   0xb   : > { %s345_s13 = smov (!%p161_p3, %s266_s13), 1  ;;  %v287_v0 = vld [vmem:[%s341_s1] ss:$0 sm:$0xff] }
   0xc   : > { %s277_s16 = sshll.u32 %s345_s13, 6  ;;  %v288_v1 = vld [vmem:[%s342_s2] ss:$0 sm:$0xff] }
   0xd   : > { %s165_s19 = scalar_lea.vmem %s340_s0, %s277_s16  ;;  %s170_s24 = scalar_lea.vmem %s343_s3, %s277_s16 }
   0xe   : > { %v171_v2 = vld [vmem:[%s165_s19] sm:$0xff]  ;;  %v172_v3 = vld [vmem:[%s165_s19 + $0x8] sm:$0xff]  ;;  %v173_v4 = vld [vmem:[%s165_s19 + $0x10] sm:$0xff] }
   0xf   : > { %v174_v5 = vld [vmem:[%s165_s19 + $0x18] sm:$0xff]  ;;  %v175_v6 = vld [vmem:[%s165_s19 + $0x20] sm:$0xff]  ;;  %v176_v7 = vld [vmem:[%s165_s19 + $0x28] sm:$0xff]  ;;  %v183_v8 = vmul.f32 %v287_v0, %v171_v2  ;;  %v184_v9 = vmul.f32 %v287_v0, %v172_v3  ;;  %v185_v10 = vmul.f32 %v287_v0, %v173_v4 }
  0x10   : > { %v177_v11 = vld [vmem:[%s165_s19 + $0x30] sm:$0xff]  ;;  %v178_v12 = vld [vmem:[%s165_s19 + $0x38] sm:$0xff]  ;;  %v186_v13 = vmul.f32 %v287_v0, %v174_v5  ;;  %v187_v14 = vmul.f32 %v287_v0, %v175_v6  ;;  %v188_v15 = vmul.f32 %v287_v0, %v176_v7 }
  0x11   : > { %v189_v16 = vmul.f32 %v287_v0, %v177_v11  ;;  %v195_v17 = vadd.f32 %v288_v1, %v183_v8  ;;  %v196_v18 = vadd.f32 %v288_v1, %v184_v9  ;;  %v190_v19 = vmul.f32 %v287_v0, %v178_v12 }
  0x12   : > { %v197_v20 = vadd.f32 %v288_v1, %v185_v10  ;;  %v198_v21 = vadd.f32 %v288_v1, %v186_v13  ;;  %v199_v22 = vadd.f32 %v288_v1, %v187_v14  ;;  %v200_v23 = vadd.f32 %v288_v1, %v188_v15 }
  0x13   : > { %203 = vst [vmem:[%s170_s24] sm:$0xff] %v195_v17  ;;  %v201_v24 = vadd.f32 %v288_v1, %v189_v16  ;;  %v202_v25 = vadd.f32 %v288_v1, %v190_v19 }
  0x14   : > { %204 = vst [vmem:[%s170_s24 + $0x8] sm:$0xff] %v196_v18 }
  0x15   : > { %205 = vst [vmem:[%s170_s24 + $0x10] sm:$0xff] %v197_v20 }
  0x16   : > { %206 = vst [vmem:[%s170_s24 + $0x18] sm:$0xff] %v198_v21 }
  0x17   : > { %207 = vst [vmem:[%s170_s24 + $0x20] sm:$0xff] %v199_v22 }
  0x18   : > { %208 = vst [vmem:[%s170_s24 + $0x28] sm:$0xff] %v200_v23 }
  0x19   : > { %209 = vst [vmem:[%s170_s24 + $0x30] sm:$0xff] %v201_v24 }
  0x1a   : > { %210 = vst [vmem:[%s170_s24 + $0x38] sm:$0xff] %v202_v25 }
  0x1b PF: > { %s13_s12 = sadd.s32 1, %s295_s12  }
  0x1c   : > { %p10_p4 = scmp.ge.s32.totalorder %s13_s12, 4  }
  0x1e   :  { %12 = sbr.rel (!%p10_p4) target bundleno = 1 (0x1), region = 62 }

// kernel: conv_block_3x3.2
= control target key start
LH: loop header
LB: loop body
LE: loop exit
PB: predicated region body
PF: predicated region fallthrough
CT: control target
= control target key end

     0   :  { %s1473_s15 = smov 0   ;;  %s1770_s0 = inlined_call_operand.vmem [shape: f32[2,2,2,9,9,4], index: 0, kind: input, shape index: {}]   ;;  %s1771_s1 = inlined_call_operand.vmem [shape: f32[9,4,128], index: 1, kind: input, shape index: {}]   ;;  %s1772_s2 = inlined_call_operand.vmem [shape: f32[2,64,128], index: 2, kind: output, shape index: {0}]   ;;  %s1773_s3 = inlined_call_operand.vmem [shape: f32[2,1,128], index: 3, kind: output, shape index: {1}]   ;;  %s1774_s4 = inlined_call_operand.vmem [shape: f32[2,1,128], index: 4, kind: output, shape index: {2}]  }
   0x1 LB: > { %s1272_s16 = sadd.s32 4294967295, %s1446_s15   ;;  %p1276_p0 = scmp.ge.s32.totalorder %s1446_s15, 1  ;;  %s1446_s15 = sphi %s1473_s15, %s15_s15  }
   0x2   : > { %p167_p1 = scmp.lt.s32.totalorder %s1446_s15, 3 }
   0x4   : > { %p168_p2 = pnand %p1276_p0, %p167_p1 }
   0x5   : > { %p199_p3 = scmp.lt.s32.totalorder (!%p168_p2), %s1272_s16, 1 }
   0x6   : > { %171 = sbr.rel (%p168_p2) target bundleno = 309 (0x135), region = 28 }
   0xb   : > { %v223_v0 = vld [vmem:[%s1771_s1] sm:$0xf]  ;;  %vm249_vm0 = vcmask 1043456   ;;  %v1297_v1 = vld [vmem:[%s1771_s1 + $0x4] sm:$0xf]  ;;  %s1776_s16 = smov (!%p199_p3, %s1272_s16), 1 }
   0xc   : > { %1428 = vmatpush.msk.msra.mxu1 %vm249_vm0, %v223_v0  ;;  %1429 = vmatpush.msk.msra.mxu2 %vm249_vm0, %v223_v0  ;;  %v1307_v2 = vld [vmem:[%s1771_s1 + $0x8] sm:$0xf]  ;;  %v1325_v3 = vld [vmem:[%s1771_s1 + $0xc] sm:$0xf]  ;;  %v1343_v4 = vld [vmem:[%s1771_s1 + $0x10] sm:$0xf]  ;;  %s211_s21 = scalar_lea.vmem %s1773_s3, %s1776_s16  ;;  %s214_s24 = scalar_lea.vmem %s1774_s4, %s1776_s16 }
   0xd   : > { %1280 = vmatpush.msk.msra.mxu0 %vm249_vm0, %v223_v0  ;;  %1430 = vmatpush.msk.msra.mxu3 %vm249_vm0, %v223_v0  ;;  %s1431_s27 = smul.u32 576, %s1776_s16  ;;  %vm224_vm1 = vcmask 31744   ;;  %v1361_v5 = vld [vmem:[%s1771_s1 + $0x14] sm:$0xf]  ;;  %v1379_v6 = vld [vmem:[%s1771_s1 + $0x18] sm:$0xf] }
   0xe   : > { %1298 = vmatpush.msk.msrb.mxu1 %vm249_vm0, %v1297_v1  ;;  %1308 = vmatpush.msk.msrb.mxu2 %vm249_vm0, %v1307_v2  ;;  %v1397_v11 = vld [vmem:[%s1771_s1 + $0x1c] sm:$0xf]  ;;  %v1415_v16 = vld [vmem:[%s1771_s1 + $0x20] sm:$0xf]  ;;  %s1427_s13 = sshll.u32 %s1776_s16, 6 }
   0xf   : > { %1326 = vmatpush.msk.msrb.mxu3 %vm249_vm0, %v1325_v3  ;;  %1344 = vmatpush.msk.msrb.mxu0 %vm249_vm0, %v1343_v4  ;;  %s1510_s30 = scalar_lea.vmem %s1770_s0, %s1431_s27  ;;  %s1728_s18 = scalar_lea.vmem %s1772_s2, %s1427_s13 }
  0x10   : > { %v1519_v7 = vld [vmem:[%s1510_s30 + $0x20] sm:$0xff]  ;;  %v1542_v12 = vld [vmem:[%s1510_s30 + $0x30] sm:$0xff] }
  0x11   : > { %v1522_v8 = vld [vmem:[%s1510_s30 + $0x40] sm:$0xff]  ;;  %1283 = vmatmul.msk.f32.vlgmr.msra.gmra.mxu1 %vm224_vm1, %v1519_v7  ;;  %v1545_v13 = vld [vmem:[%s1510_s30 + $0x50] sm:$0xff] }
  0x12   : > { %v215_v9 = vld [vmem:[%s1510_s30] sm:$0xff]  ;;  %1285 = vmatmul.msk.f32.vlgmr.msra.gmra.mxu2 %vm224_vm1, %v1522_v8  ;;  %1362 = vmatpush.msk.msra.mxu1 %vm249_vm0, %v1361_v5  ;;  %v1548_v14 = vld [vmem:[%s1510_s30 + $0x10] sm:$0xff] }
  0x13   : > { %v1530_v10 = vld [vmem:[%s1510_s30 + $0x60] sm:$0xff]  ;;  %1281 = vmatmul.msk.f32.vlgmr.msra.gmra.mxu0 %vm224_vm1, %v215_v9  ;;  %1380 = vmatpush.msk.msra.mxu2 %vm249_vm0, %v1379_v6  ;;  %v1551_v15 = vld [vmem:[%s1510_s30 + $0x70] sm:$0xff] }
  0x14   : > { %1287 = vmatmul.msk.f32.vlgmr.msra.gmra.mxu3 %vm224_vm1, %v1530_v10  ;;  %1416 = vmatpush.msk.msra.mxu0 %vm249_vm0, %v1415_v16  ;;  %v1289_v17 = vld [vmem:[%s1510_s30 + $0x90] sm:$0xff]  ;;  %v405_v18 = vld [vmem:[%s1510_s30 + $0x1] sm:$0xff] }
  0x15   : > { %1398 = vmatpush.msk.msra.mxu3 %vm249_vm0, %v1397_v11  ;;  %v1317_v19 = vld [vmem:[%s1510_s30 + $0x120] sm:$0xff]  ;;  %v1335_v20 = vld [vmem:[%s1510_s30 + $0x1b0] sm:$0xff] }
  0x16   : > { %v1290_v21 = vld [vmem:[%s1510_s30 + $0xa0] sm:$0xff]  ;;  %v406_v22 = vld [vmem:[%s1510_s30 + $0x11] sm:$0xff] }
  0x17   : > { %v1318_v23 = vld [vmem:[%s1510_s30 + $0x130] sm:$0xff]  ;;  %v1336_v24 = vld [vmem:[%s1510_s30 + $0x1c0] sm:$0xff] }
  0x18   : > { %v1291_v25 = vld [vmem:[%s1510_s30 + $0xb0] sm:$0xff]  ;;  %v407_v26 = vld [vmem:[%s1510_s30 + $0x21] sm:$0xff] }
  0x19   : > { %1284 = vmatmul.msk.f32.gmra.mxu1 %vm224_vm1, %v1542_v12  ;;  %v1319_v27 = vld [vmem:[%s1510_s30 + $0x140] sm:$0xff]  ;;  %v1337_v28 = vld [vmem:[%s1510_s30 + $0x1d0] sm:$0xff] }
  0x1a   : > { %1286 = vmatmul.msk.f32.gmra.mxu2 %vm224_vm1, %v1545_v13  ;;  %v1292_v29 = vld [vmem:[%s1510_s30 + $0xc0] sm:$0xff]  ;;  %v408_v30 = vld [vmem:[%s1510_s30 + $0x31] sm:$0xff] }
  0x1b   : > { %1282 = vmatmul.msk.f32.gmra.mxu0 %vm224_vm1, %v1548_v14  ;;  %v1320_v31 = vld [vmem:[%s1510_s30 + $0x150] sm:$0xff]  ;;  %v1338_v32 = vld [vmem:[%s1510_s30 + $0x1e0] sm:$0xff] }
  0x1c   : > { %1288 = vmatmul.msk.f32.gmra.mxu3 %vm224_vm1, %v1551_v15  ;;  %v1293_v33 = vld [vmem:[%s1510_s30 + $0xd0] sm:$0xff]  ;;  %v409_v34 = vld [vmem:[%s1510_s30 + $0x41] sm:$0xff] }
  0x1d   : > { %v1321_v35 = vld [vmem:[%s1510_s30 + $0x160] sm:$0xff]  ;;  %v1339_v36 = vld [vmem:[%s1510_s30 + $0x1f0] sm:$0xff] }
  0x1e   : > { %v1294_v37 = vld [vmem:[%s1510_s30 + $0xe0] sm:$0xff]  ;;  %v410_v38 = vld [vmem:[%s1510_s30 + $0x51] sm:$0xff] }
  0x1f   : > { %v1322_v39 = vld [vmem:[%s1510_s30 + $0x170] sm:$0xff]  ;;  %v1340_v40 = vld [vmem:[%s1510_s30 + $0x200] sm:$0xff] }
  0x20   : > { %v1295_v41 = vld [vmem:[%s1510_s30 + $0xf0] sm:$0xff]  ;;  %v411_v42 = vld [vmem:[%s1510_s30 + $0x61] sm:$0xff] }
  0x21   : > { %1299 = vmatmul.msk.f32.vlgmr.msrb.gmra.mxu1 %vm224_vm1, %v1289_v17  ;;  %v1323_v43 = vld [vmem:[%s1510_s30 + $0x180] sm:$0xff]  ;;  %v1341_v44 = vld [vmem:[%s1510_s30 + $0x210] sm:$0xff] }
  0x22   : > { %1309 = vmatmul.msk.f32.vlgmr.msrb.gmra.mxu2 %vm224_vm1, %v405_v18  ;;  %v1296_v45 = vld [vmem:[%s1510_s30 + $0x100] sm:$0xff]  ;;  %v412_v46 = vld [vmem:[%s1510_s30 + $0x71] sm:$0xff] }
  0x23   : > { %1345 = vmatmul.msk.f32.vlgmr.msrb.gmra.mxu0 %vm224_vm1, %v1335_v20  ;;  %v1324_v47 = vld [vmem:[%s1510_s30 + $0x190] sm:$0xff]  ;;  %v1342_v48 = vld [vmem:[%s1510_s30 + $0x220] sm:$0xff] }
  0x24   : > { %1327 = vmatmul.msk.f32.vlgmr.msrb.gmra.mxu3 %vm224_vm1, %v1317_v19  ;;  %v1353_v49 = vld [vmem:[%s1510_s30 + $0x121] sm:$0xff]  ;;  %v1354_v50 = vld [vmem:[%s1510_s30 + $0x131] sm:$0xff] }
  0x25   : > { %v1355_v51 = vld [vmem:[%s1510_s30 + $0x141] sm:$0xff]  ;;  %v1356_v52 = vld [vmem:[%s1510_s30 + $0x151] sm:$0xff] }
  0x26   : > { %v1357_v53 = vld [vmem:[%s1510_s30 + $0x161] sm:$0xff]  ;;  %v1358_v54 = vld [vmem:[%s1510_s30 + $0x171] sm:$0xff] }
  0x27   : > { %v1359_v56 = vld [vmem:[%s1510_s30 + $0x181] sm:$0xff]  ;;  %v1360_v61 = vld [vmem:[%s1510_s30 + $0x191] sm:$0xff] }
  0x28   : > { %v1378_v62 = vld [vmem:[%s1510_s30 + $0x80] sm:$0xff]  ;;  %v1396_v0 = vld [vmem:[%s1510_s30 + $0x110] sm:$0xff] }
  0x29   : > { %1300 = vmatmul.msk.f32.gmra.mxu1 %vm224_vm1, %v1290_v21  ;;  %v1414_v1 = vld [vmem:[%s1510_s30 + $0x81] sm:$0xff] }
  0x2a   : > { %1310 = vmatmul.msk.f32.gmra.mxu2 %vm224_vm1, %v406_v22 }
  0x2b   : > { %1346 = vmatmul.msk.f32.gmra.mxu0 %vm224_vm1, %v1336_v24 }
  0x2c   : > { %1328 = vmatmul.msk.f32.gmra.mxu3 %vm224_vm1, %v1318_v23 }
  0x31   : > { %1301 = vmatmul.msk.f32.gmra.mxu1 %vm224_vm1, %v1291_v25 }
  0x32   : > { %1311 = vmatmul.msk.f32.gmra.mxu2 %vm224_vm1, %v407_v26 }
  0x33   : > { %1347 = vmatmul.msk.f32.gmra.mxu0 %vm224_vm1, %v1337_v28 }
  0x34   : > { %1329 = vmatmul.msk.f32.gmra.mxu3 %vm224_vm1, %v1319_v27 }
  0x39   : > { %1302 = vmatmul.msk.f32.gmra.mxu1 %vm224_vm1, %v1292_v29 }
  0x3a   : > { %1312 = vmatmul.msk.f32.gmra.mxu2 %vm224_vm1, %v408_v30 }
  0x3b   : > { %1348 = vmatmul.msk.f32.gmra.mxu0 %vm224_vm1, %v1338_v32 }
  0x3c   : > { %1330 = vmatmul.msk.f32.gmra.mxu3 %vm224_vm1, %v1320_v31 }
  0x41   : > { %1303 = vmatmul.msk.f32.gmra.mxu1 %vm224_vm1, %v1293_v33 }
  0x42   : > { %1313 = vmatmul.msk.f32.gmra.mxu2 %vm224_vm1, %v409_v34 }
  0x43   : > { %1349 = vmatmul.msk.f32.gmra.mxu0 %vm224_vm1, %v1339_v36 }
  0x44   : > { %1331 = vmatmul.msk.f32.gmra.mxu3 %vm224_vm1, %v1321_v35 }
  0x49   : > { %1304 = vmatmul.msk.f32.gmra.mxu1 %vm224_vm1, %v1294_v37 }
  0x4a   : > { %1314 = vmatmul.msk.f32.gmra.mxu2 %vm224_vm1, %v410_v38 }
  0x4b   : > { %1350 = vmatmul.msk.f32.gmra.mxu0 %vm224_vm1, %v1340_v40 }
  0x4c   : > { %1332 = vmatmul.msk.f32.gmra.mxu3 %vm224_vm1, %v1322_v39 }
  0x51   : > { %1305 = vmatmul.msk.f32.gmra.mxu1 %vm224_vm1, %v1295_v41 }
  0x52   : > { %1315 = vmatmul.msk.f32.gmra.mxu2 %vm224_vm1, %v411_v42 }
  0x53   : > { %1351 = vmatmul.msk.f32.gmra.mxu0 %vm224_vm1, %v1341_v44 }
  0x54   : > { %1333 = vmatmul.msk.f32.gmra.mxu3 %vm224_vm1, %v1323_v43 }
  0x59   : > { %1306 = vmatmul.msk.f32.gmra.mxu1 %vm224_vm1, %v1296_v45 }
  0x5a   : > { %1316 = vmatmul.msk.f32.gmra.mxu2 %vm224_vm1, %v412_v46 }
  0x5b   : > { %1352 = vmatmul.msk.f32.gmra.mxu0 %vm224_vm1, %v1342_v48 }
  0x5c   : > { %1334 = vmatmul.msk.f32.gmra.mxu3 %vm224_vm1, %v1324_v47 }
  0x61   : > { %1363 = vmatmul.msk.f32.vlgmr.msra.gmra.mxu1 %vm224_vm1, %v1353_v49 }
  0x62   : > { %1381 = vmatmul.msk.f32.vlgmr.msra.gmra.mxu2 %vm224_vm1, %v1548_v14 }
  0x63   : > { %1417 = vmatmul.msk.f32.vlgmr.msra.gmra.mxu0 %vm224_vm1, %v406_v22 }
  0x64   : > { %1399 = vmatmul.msk.f32.vlgmr.msra.gmra.mxu3 %vm224_vm1, %v1290_v21 }
  0x69   : > { %1364 = vmatmul.msk.f32.gmra.mxu1 %vm224_vm1, %v1354_v50 }
  0x6a   : > { %1382 = vmatmul.msk.f32.gmra.mxu2 %vm224_vm1, %v1519_v7 }
  0x6b   : > { %1418 = vmatmul.msk.f32.gmra.mxu0 %vm224_vm1, %v407_v26 }
  0x6c   : > { %1400 = vmatmul.msk.f32.gmra.mxu3 %vm224_vm1, %v1291_v25 }
  0x71   : > { %1365 = vmatmul.msk.f32.gmra.mxu1 %vm224_vm1, %v1355_v51 }
  0x72   : > { %1383 = vmatmul.msk.f32.gmra.mxu2 %vm224_vm1, %v1542_v12 }
  0x73   : > { %1419 = vmatmul.msk.f32.gmra.mxu0 %vm224_vm1, %v408_v30 }
  0x74   : > { %1401 = vmatmul.msk.f32.gmra.mxu3 %vm224_vm1, %v1292_v29 }
  0x79   : > { %1366 = vmatmul.msk.f32.gmra.mxu1 %vm224_vm1, %v1356_v52 }
  0x7a   : > { %1384 = vmatmul.msk.f32.gmra.mxu2 %vm224_vm1, %v1522_v8 }
  0x7b   : > { %1420 = vmatmul.msk.f32.gmra.mxu0 %vm224_vm1, %v409_v34 }
  0x7c   : > { %1402 = vmatmul.msk.f32.gmra.mxu3 %vm224_vm1, %v1293_v33 }
  0x81   : > { %1367 = vmatmul.msk.f32.gmra.mxu1 %vm224_vm1, %v1357_v53 }
  0x82   : > { %1385 = vmatmul.msk.f32.gmra.mxu2 %vm224_vm1, %v1545_v13 }
  0x83   : > { %1421 = vmatmul.msk.f32.gmra.mxu0 %vm224_vm1, %v410_v38 }
  0x84   : > { %1403 = vmatmul.msk.f32.gmra.mxu3 %vm224_vm1, %v1294_v37 }
  0x89   : > { %1368 = vmatmul.msk.f32.gmra.mxu1 %vm224_vm1, %v1358_v54 }
  0x8a   : > { %1386 = vmatmul.msk.f32.gmra.mxu2 %vm224_vm1, %v1530_v10 }
  0x8b   : > { %1422 = vmatmul.msk.f32.gmra.mxu0 %vm224_vm1, %v411_v42 }
  0x8c   : > { %1404 = vmatmul.msk.f32.gmra.mxu3 %vm224_vm1, %v1295_v41 }
  0x8e   : > { %v1665_v55 = vpop.f32.mrf.mxu1 }
  0x90   : > { %v270_v57 = vpop.f32.mrf.mxu0 }
  0x91   : > { %1369 = vmatmul.msk.f32.gmra.mxu1 %vm224_vm1, %v1359_v56 }
  0x92   : > { %1387 = vmatmul.msk.f32.gmra.mxu2 %vm224_vm1, %v1551_v15 }
  0x93   : > { %1423 = vmatmul.msk.f32.gmra.mxu0 %vm224_vm1, %v412_v46 }
  0x94   : > { %1405 = vmatmul.msk.f32.gmra.mxu3 %vm224_vm1, %v1296_v45 }
  0x95   : > { %v1673_v58 = vpop.f32.mrf.mxu2 }
  0x96   : > { %v1677_v60 = vpop.f32.mrf.mxu1 }
  0x97   : > { %v1675_v59 = vpop.f32.mrf.mxu3 }
  0x98   : > { %v273_v63 = vpop.f32.mrf.mxu0 }
  0x99   : > { %1370 = vmatmul.msk.f32.gmra.mxu1 %vm224_vm1, %v1360_v61 }
  0x9a   : > { %1388 = vmatmul.msk.f32.gmra.mxu2 %vm224_vm1, %v1378_v62 }
  0x9b   : > { %1424 = vmatmul.msk.f32.gmra.mxu0 %vm224_vm1, %v1414_v1 }
  0x9c   : > { %1406 = vmatmul.msk.f32.gmra.mxu3 %vm224_vm1, %v1396_v0 }
  0x9d   : > { %v1687_v2 = vpop.f32.mrf.mxu2 }
  0x9e   : > { %v357_v4 = vpop.f32.mrf.mxu1 }
  0x9f   : > { %v1689_v3 = vpop.f32.mrf.mxu3  ;;  %v389_v33 = vadd.f32 %v357_v4, %v270_v57 }
  0xa0   : > { %v665_v5 = vpop.f32.mrf.mxu0 }
  0xa5   : > { %v459_v6 = vpop.f32.mrf.mxu2 }
  0xa6   : > { %v360_v8 = vpop.f32.mrf.mxu1  ;;  %v491_v35 = vadd.f32 %v459_v6, %v389_v33 }
  0xa7   : > { %v562_v7 = vpop.f32.mrf.mxu3  ;;  %v390_v40 = vadd.f32 %v360_v8, %v273_v63 }
  0xa8   : > { %v668_v9 = vpop.f32.mrf.mxu0  ;;  %v594_v37 = vadd.f32 %v562_v7, %v491_v35 }
  0xaa   : > { %v697_v43 = vadd.f32 %v665_v5, %v594_v37 }
  0xad   : > { %v462_v10 = vpop.f32.mrf.mxu2 }
  0xae   : > { %v363_v12 = vpop.f32.mrf.mxu1  ;;  %v492_v42 = vadd.f32 %v462_v10, %v390_v40 }
  0xaf   : > { %v565_v11 = vpop.f32.mrf.mxu3  ;;  %v391_v50 = vadd.f32 %v363_v12, %v1665_v55 }
  0xb0   : > { %v671_v13 = vpop.f32.mrf.mxu0  ;;  %v595_v46 = vadd.f32 %v565_v11, %v492_v42 }
  0xb2   : > { %v698_v54 = vadd.f32 %v668_v9, %v595_v46 }
  0xb5   : > { %v465_v14 = vpop.f32.mrf.mxu2 }
  0xb6   : > { %v366_v16 = vpop.f32.mrf.mxu1  ;;  %v493_v53 = vadd.f32 %v465_v14, %v391_v50 }
  0xb7   : > { %v568_v15 = vpop.f32.mrf.mxu3  ;;  %v392_v55 = vadd.f32 %v366_v16, %v1677_v60 }
  0xb8   : > { %v1691_v17 = vpop.f32.mrf.mxu0  ;;  %v596_v62 = vadd.f32 %v568_v15, %v493_v53 }
  0xba   : > { %v699_v7 = vadd.f32 %v671_v13, %v596_v62 }
  0xbd   : > { %v468_v18 = vpop.f32.mrf.mxu2 }
  0xbe   : > { %v369_v20 = vpop.f32.mrf.mxu1  ;;  %v494_v6 = vadd.f32 %v468_v18, %v392_v55 }
  0xbf   : > { %v571_v19 = vpop.f32.mrf.mxu3  ;;  %v393_v40 = vadd.f32 %v369_v20, %v1673_v58 }
  0xc0   : > { %v1693_v21 = vpop.f32.mrf.mxu0  ;;  %v597_v33 = vadd.f32 %v571_v19, %v494_v6 }
  0xc2   : > { %v700_v13 = vadd.f32 %v1691_v17, %v597_v33 }
  0xc5   : > { %v1695_v22 = vpop.f32.mrf.mxu2 }
  0xc6   : > { %v1699_v24 = vpop.f32.mrf.mxu1  ;;  %v495_v18 = vadd.f32 %v1695_v22, %v393_v40 }
  0xc7   : > { %v1697_v23 = vpop.f32.mrf.mxu3  ;;  %v394_v58 = vadd.f32 %v1699_v24, %v1687_v2 }
  0xc8   : > { %v1701_v25 = vpop.f32.mrf.mxu0  ;;  %v598_v19 = vadd.f32 %v1697_v23, %v495_v18 }
  0xca   : > { %v701_v50 = vadd.f32 %v1693_v21, %v598_v19 }
  0xcd   : > { %v1703_v26 = vpop.f32.mrf.mxu2 }
  0xce   : > { %v1707_v28 = vpop.f32.mrf.mxu1  ;;  %v496_v17 = vadd.f32 %v1703_v26, %v394_v58 }
  0xcf   : > { %v1705_v27 = vpop.f32.mrf.mxu3  ;;  %v395_v2 = vadd.f32 %v1707_v28, %v1675_v59 }
  0xd0   : > { %v1709_v29 = vpop.f32.mrf.mxu0 }
  0xd5   : > { %v1711_v30 = vpop.f32.mrf.mxu2 }
  0xd6   : > { %v1715_v32 = vpop.f32.mrf.mxu1  ;;  %v497_v26 = vadd.f32 %v1711_v30, %v395_v2 }
  0xd7   : > { %v1713_v31 = vpop.f32.mrf.mxu3  ;;  %v396_v59 = vadd.f32 %v1715_v32, %v1689_v3 }
  0xd8   : > { %v1717_v34 = vpop.f32.mrf.mxu0  ;;  %v600_v6 = vadd.f32 %v1713_v31, %v497_v26 }
  0xda   : > { %v703_v30 = vadd.f32 %v1709_v29, %v600_v6 }
  0xdd   : > { %v1719_v36 = vpop.f32.mrf.mxu2 }
  0xde   : > { %v767_v39 = vpop.f32.mrf.mxu1 }
  0xdf   : > { %v1721_v38 = vpop.f32.mrf.mxu3  ;;  %v799_v44 = vadd.f32 %v767_v39, %v697_v43 }
  0xe0   : > { %v1075_v41 = vpop.f32.mrf.mxu0 }
  0xe5   : > { %v870_v45 = vpop.f32.mrf.mxu2 }
  0xe6   : > { %v902_v47 = vadd.f32 %v870_v45, %v799_v44  ;;  %v770_v49 = vpop.f32.mrf.mxu1 }
  0xe7   : > { %v973_v48 = vpop.f32.mrf.mxu3  ;;  %v800_v57 = vadd.f32 %v770_v49, %v698_v54 }
  0xe8   : > { %v1005_v51 = vadd.f32 %v973_v48, %v902_v47  ;;  %v1078_v52 = vpop.f32.mrf.mxu0 }
  0xea   : > { %v1107_v56 = vadd.f32 %v1075_v41, %v1005_v51 }
  0xec   : > { %1115 = vst [vmem:[%s1728_s18] sm:$0xff] %v1107_v56  ;;  %v1145_v11 = vmul.f32 %v1107_v56, %v1107_v56 }
  0xed   : > { %v873_v61 = vpop.f32.mrf.mxu2 }
  0xee   : > { %v903_v63 = vadd.f32 %v873_v61, %v800_v57  ;;  %v773_v1 = vpop.f32.mrf.mxu1 }
  0xef   : > { %v976_v0 = vpop.f32.mrf.mxu3  ;;  %v801_v10 = vadd.f32 %v773_v1, %v699_v7 }
  0xf0   : > { %v1006_v4 = vadd.f32 %v976_v0, %v903_v63  ;;  %v1081_v5 = vpop.f32.mrf.mxu0 }
  0xf2   : > { %v1108_v8 = vadd.f32 %v1078_v52, %v1006_v4 }
  0xf4   : > { %1116 = vst [vmem:[%s1728_s18 + $0x8] sm:$0xff] %v1108_v8  ;;  %v1131_v9 = vadd.f32 %v1108_v8, %v1107_v56  ;;  %v1146_v12 = vmul.f32 %v1108_v8, %v1108_v8  ;;  %v599_v56 = vadd.f32 %v1705_v27, %v496_v17 }
  0xf5   : > { %v876_v14 = vpop.f32.mrf.mxu2 }
  0xf6   : > { %v904_v35 = vadd.f32 %v876_v14, %v801_v10  ;;  %v1153_v37 = vadd.f32 %v1146_v12, %v1145_v11  ;;  %v776_v39 = vpop.f32.mrf.mxu1  ;;  %v702_v21 = vadd.f32 %v1701_v25, %v599_v56  ;;  %v498_v25 = vadd.f32 %v1719_v36, %v396_v59 }
  0xf7   : > { %v979_v15 = vpop.f32.mrf.mxu3  ;;  %v802_v42 = vadd.f32 %v776_v39, %v700_v13 }
  0xf8   : > { %v1007_v60 = vadd.f32 %v979_v15, %v904_v35  ;;  %v1084_v16 = vpop.f32.mrf.mxu0  ;;  %v601_v15 = vadd.f32 %v1721_v38, %v498_v25 }
  0xfa   : > { %v1109_v41 = vadd.f32 %v1081_v5, %v1007_v60  ;;  %v704_v36 = vadd.f32 %v1717_v34, %v601_v15 }
  0xfc   : > { %1117 = vst [vmem:[%s1728_s18 + $0x10] sm:$0xff] %v1109_v41  ;;  %v1132_v43 = vadd.f32 %v1131_v9, %v1109_v41  ;;  %v1147_v44 = vmul.f32 %v1109_v41, %v1109_v41 }
  0xfd   : > { %v879_v45 = vpop.f32.mrf.mxu2 }
  0xfe   : > { %v905_v46 = vadd.f32 %v879_v45, %v802_v42  ;;  %v1154_v48 = vadd.f32 %v1153_v37, %v1147_v44  ;;  %v779_v49 = vpop.f32.mrf.mxu1 }
  0xff   : > { %v982_v47 = vpop.f32.mrf.mxu3  ;;  %v803_v52 = vadd.f32 %v779_v49, %v701_v50 }
 0x100   : > { %v1008_v20 = vadd.f32 %v982_v47, %v905_v46  ;;  %v1087_v22 = vpop.f32.mrf.mxu0 }
 0x102   : > { %v1110_v51 = vadd.f32 %v1084_v16, %v1008_v20 }
 0x104   : > { %1118 = vst [vmem:[%s1728_s18 + $0x18] sm:$0xff] %v1110_v51  ;;  %v1133_v53 = vadd.f32 %v1132_v43, %v1110_v51  ;;  %v1148_v54 = vmul.f32 %v1110_v51, %v1110_v51 }
 0x105   : > { %v882_v23 = vpop.f32.mrf.mxu2 }
 0x106   : > { %v906_v57 = vadd.f32 %v882_v23, %v803_v52  ;;  %v1155_v62 = vadd.f32 %v1154_v48, %v1148_v54  ;;  %v782_v63 = vpop.f32.mrf.mxu1 }
 0x107   : > { %v985_v61 = vpop.f32.mrf.mxu3  ;;  %v804_v55 = vadd.f32 %v782_v63, %v702_v21 }
 0x108   : > { %v1009_v24 = vadd.f32 %v985_v61, %v906_v57  ;;  %v1090_v1 = vpop.f32.mrf.mxu0 }
 0x10a   : > { %v1111_v0 = vadd.f32 %v1087_v22, %v1009_v24 }
 0x10c   : > { %1119 = vst [vmem:[%s1728_s18 + $0x20] sm:$0xff] %v1111_v0  ;;  %v1134_v4 = vadd.f32 %v1133_v53, %v1111_v0  ;;  %v1149_v5 = vmul.f32 %v1111_v0, %v1111_v0 }
 0x10d   : > { %v885_v27 = vpop.f32.mrf.mxu2 }
 0x10e   : > { %v907_v7 = vadd.f32 %v885_v27, %v804_v55  ;;  %v1156_v10 = vadd.f32 %v1155_v62, %v1149_v5  ;;  %v785_v11 = vpop.f32.mrf.mxu1 }
 0x10f   : > { %v988_v8 = vpop.f32.mrf.mxu3  ;;  %v805_v12 = vadd.f32 %v785_v11, %v703_v30 }
 0x110   : > { %v1010_v28 = vadd.f32 %v988_v8, %v907_v7  ;;  %v1093_v31 = vpop.f32.mrf.mxu0 }
 0x112   : > { %v1112_v9 = vadd.f32 %v1090_v1, %v1010_v28 }
 0x114   : > { %1120 = vst [vmem:[%s1728_s18 + $0x28] sm:$0xff] %v1112_v9  ;;  %v1135_v14 = vadd.f32 %v1134_v4, %v1112_v9  ;;  %v1150_v33 = vmul.f32 %v1112_v9, %v1112_v9 }
 0x115   : > { %v888_v35 = vpop.f32.mrf.mxu2 }
 0x116   : > { %v908_v37 = vadd.f32 %v888_v35, %v805_v12  ;;  %v1157_v40 = vadd.f32 %v1156_v10, %v1150_v33  ;;  %v788_v32 = vpop.f32.mrf.mxu1 }
 0x117   : > { %v991_v39 = vpop.f32.mrf.mxu3  ;;  %v806_v29 = vadd.f32 %v788_v32, %v704_v36 }
 0x118   : > { %v1011_v3 = vadd.f32 %v991_v39, %v908_v37  ;;  %v1096_v44 = vpop.f32.mrf.mxu0 }
 0x11a   : > { %v1113_v60 = vadd.f32 %v1093_v31, %v1011_v3 }
 0x11c   : > { %1121 = vst [vmem:[%s1728_s18 + $0x30] sm:$0xff] %v1113_v60  ;;  %v1136_v16 = vadd.f32 %v1135_v14, %v1113_v60  ;;  %v1151_v18 = vmul.f32 %v1113_v60, %v1113_v60 }
 0x11d   : > { %v891_v13 = vpop.f32.mrf.mxu2 }
 0x11e   : > { %v909_v41 = vadd.f32 %v891_v13, %v806_v29  ;;  %v1158_v43 = vadd.f32 %v1157_v40, %v1151_v18 }
 0x11f   : > { %v994_v42 = vpop.f32.mrf.mxu3 }
 0x120   : > { %v1012_v38 = vadd.f32 %v994_v42, %v909_v41 }
 0x122   : > { %v1114_v45 = vadd.f32 %v1096_v44, %v1012_v38 }
 0x124   : > { %1122 = vst [vmem:[%s1728_s18 + $0x38] sm:$0xff] %v1114_v45  ;;  %v1137_v19 = vadd.f32 %v1136_v16, %v1114_v45  ;;  %v1152_v46 = vmul.f32 %v1114_v45, %v1114_v45 }
 0x126   : > { %v1138_v47 = vrot.slane %v1137_v19, 4  ;;  %v1159_v48 = vadd.f32 %v1158_v43, %v1152_v46 }
 0x128   : > { %v1139_v34 = vadd.f32 %v1138_v47, %v1137_v19  ;;  %v1160_v49 = vrot.slane %v1159_v48, 4 }
 0x12a   : > { %v1140_v58 = vrot.slane %v1139_v34, 2  ;;  %v1161_v20 = vadd.f32 %v1160_v49, %v1159_v48 }
 0x12c   : > { %v1141_v22 = vadd.f32 %v1140_v58, %v1139_v34  ;;  %v1162_v17 = vrot.slane %v1161_v20, 2 }
 0x12e   : > { %v1142_v50 = vrot.slane %v1141_v22, 1  ;;  %v1163_v51 = vadd.f32 %v1162_v17, %v1161_v20 }
 0x130   : > { %v1143_v52 = vadd.f32 %v1142_v50, %v1141_v22  ;;  %v1164_v53 = vrot.slane %v1163_v51, 1 }
 0x132   : > { %1144 = vst [vmem:[%s211_s21] sm:$0x1] %v1143_v52  ;;  %v1165_v54 = vadd.f32 %v1164_v53, %v1163_v51 }
 0x134   : > { %1166 = vst [vmem:[%s214_s24] sm:$0x1] %v1165_v54 }
 0x135 PF: > { %s15_s15 = sadd.s32 1, %s1446_s15  }
 0x136   : > { %p12_p4 = scmp.ge.s32.totalorder %s15_s15, 4  }
 0x138   :  { %14 = sbr.rel (!%p12_p4) target bundleno = 1 (0x1), region = 95 }

</bundles_post_ra>
